<compile_context>
chip_gen: v7x
topology: tpu7x:2x2x1
jax: 0.10.0
libtpu: 0.0.40
codegen_flags: <defaults>
</compile_context>

<pallas_src>
import math
import functools

import jax
import jax.numpy as jnp
from jax.experimental import pallas as pl
from jax.experimental.pallas import tpu as pltpu


# ----------------------------------------------------------------------------
# helpers
# ----------------------------------------------------------------------------
def _cparams(*sems, vmem_mb=None):
    kw = {}
    if vmem_mb is not None:
        kw["vmem_limit_bytes"] = int(vmem_mb) * 1024 * 1024
    return pltpu.CompilerParams(dimension_semantics=tuple(sems), **kw)


def _row_tile(M, tm=512):
    # full block if it fits, else a multiple-of-8 tile with a cdiv grid.
    return M if M <= tm else tm


# ----------------------------------------------------------------------------
# generic linear: out = x @ w + b   (bf16 weights resident, f32 accumulate)
# ----------------------------------------------------------------------------
def _linear_kernel(x_ref, w_ref, b_ref, o_ref):
    acc = jnp.dot(x_ref[...].astype(jnp.bfloat16), w_ref[...],
                  preferred_element_type=jnp.float32)
    o_ref[...] = (acc + b_ref[...]).astype(o_ref.dtype)


def linear(x2d, w_bf16, b, *, out_dtype=None, tm=512, vmem_mb=32):
    M, K = x2d.shape
    N = w_bf16.shape[1]
    TM = _row_tile(M, tm)
    return pl.pallas_call(
        _linear_kernel,
        out_shape=jax.ShapeDtypeStruct((M, N), out_dtype or x2d.dtype),
        grid=(pl.cdiv(M, TM),),
        in_specs=[pl.BlockSpec((TM, K), lambda i: (i, 0)),
                  pl.BlockSpec((K, N), lambda i: (0, 0)),
                  pl.BlockSpec((1, N), lambda i: (0, 0))],
        out_specs=pl.BlockSpec((TM, N), lambda i: (i, 0)),
        compiler_params=_cparams("parallel", vmem_mb=vmem_mb),
    )(x2d, w_bf16, b.reshape(1, N))


# ----------------------------------------------------------------------------
# linear with in-kernel positional add: out = (x + pos) @ w + b
# ----------------------------------------------------------------------------
def _linear_pos_kernel(x_ref, p_ref, w_ref, b_ref, o_ref):
    xq = (x_ref[...] + p_ref[...]).astype(jnp.bfloat16)
    o_ref[...] = (jnp.dot(xq, w_ref[...], preferred_element_type=jnp.float32)
                  + b_ref[...]).astype(o_ref.dtype)


def linear_pos(x2d, pos2d, w_bf16, b, *, out_dtype=None, tm=512, vmem_mb=32):
    M, K = x2d.shape
    N = w_bf16.shape[1]
    TM = _row_tile(M, tm)
    return pl.pallas_call(
        _linear_pos_kernel,
        out_shape=jax.ShapeDtypeStruct((M, N), out_dtype or x2d.dtype),
        grid=(pl.cdiv(M, TM),),
        in_specs=[pl.BlockSpec((TM, K), lambda i: (i, 0)),
                  pl.BlockSpec((TM, K), lambda i: (i, 0)),
                  pl.BlockSpec((K, N), lambda i: (0, 0)),
                  pl.BlockSpec((1, N), lambda i: (0, 0))],
        out_specs=pl.BlockSpec((TM, N), lambda i: (i, 0)),
        compiler_params=_cparams("parallel", vmem_mb=vmem_mb),
    )(x2d, pos2d, w_bf16, b.reshape(1, N))


# ----------------------------------------------------------------------------
# fused self-attention input projections:
#   qk = (x + pos) @ Wqk + bqk      (Q weight columns pre-scaled by 1/sqrt(hd))
#   v  =  x        @ Wv  + bv
# ----------------------------------------------------------------------------
def _sa_qkv_kernel(x_ref, p_ref, wqk_ref, bqk_ref, wv_ref, bv_ref, qk_ref, v_ref):
    x = x_ref[...]
    xq = (x + p_ref[...]).astype(jnp.bfloat16)
    qk_ref[...] = (jnp.dot(xq, wqk_ref[...], preferred_element_type=jnp.float32)
                   + bqk_ref[...]).astype(qk_ref.dtype)
    v_ref[...] = (jnp.dot(x.astype(jnp.bfloat16), wv_ref[...],
                          preferred_element_type=jnp.float32)
                  + bv_ref[...]).astype(v_ref.dtype)


def sa_qkv_proj(x2d, pos2d, wqk, bqk, wv, bv, *, tm=512, vmem_mb=32):
    M, D = x2d.shape
    N2 = wqk.shape[1]
    TM = _row_tile(M, tm)
    return pl.pallas_call(
        _sa_qkv_kernel,
        out_shape=(jax.ShapeDtypeStruct((M, N2), jnp.bfloat16),
                   jax.ShapeDtypeStruct((M, D), jnp.bfloat16)),
        grid=(pl.cdiv(M, TM),),
        in_specs=[pl.BlockSpec((TM, D), lambda i: (i, 0)),
                  pl.BlockSpec((TM, D), lambda i: (i, 0)),
                  pl.BlockSpec((D, N2), lambda i: (0, 0)),
                  pl.BlockSpec((1, N2), lambda i: (0, 0)),
                  pl.BlockSpec((D, D), lambda i: (0, 0)),
                  pl.BlockSpec((1, D), lambda i: (0, 0))],
        out_specs=(pl.BlockSpec((TM, N2), lambda i: (i, 0)),
                   pl.BlockSpec((TM, D), lambda i: (i, 0))),
        compiler_params=_cparams("parallel", vmem_mb=vmem_mb),
    )(x2d, pos2d, wqk, bqk.reshape(1, N2), wv, bv.reshape(1, D))


# ----------------------------------------------------------------------------
# fused: out = LayerNorm(x @ w + b + residual)
# ----------------------------------------------------------------------------
def _linear_add_ln_kernel(x_ref, w_ref, b_ref, r_ref, g_ref, be_ref, o_ref, *, eps):
    y = jnp.dot(x_ref[...].astype(jnp.bfloat16), w_ref[...],
                preferred_element_type=jnp.float32)
    y = y + b_ref[...] + r_ref[...]
    mu = jnp.mean(y, axis=-1, keepdims=True)
    var = jnp.mean((y - mu) ** 2, axis=-1, keepdims=True)
    o_ref[...] = ((y - mu) * jax.lax.rsqrt(var + eps) * g_ref[...]
                  + be_ref[...]).astype(o_ref.dtype)


def linear_add_ln(x2d, w_bf16, b, res2d, gamma, beta, *, eps=1e-5, tm=512, vmem_mb=32):
    M, K = x2d.shape
    N = w_bf16.shape[1]
    TM = _row_tile(M, tm)
    return pl.pallas_call(
        functools.partial(_linear_add_ln_kernel, eps=eps),
        out_shape=jax.ShapeDtypeStruct((M, N), res2d.dtype),
        grid=(pl.cdiv(M, TM),),
        in_specs=[pl.BlockSpec((TM, K), lambda i: (i, 0)),
                  pl.BlockSpec((K, N), lambda i: (0, 0)),
                  pl.BlockSpec((1, N), lambda i: (0, 0)),
                  pl.BlockSpec((TM, N), lambda i: (i, 0)),
                  pl.BlockSpec((1, N), lambda i: (0, 0)),
                  pl.BlockSpec((1, N), lambda i: (0, 0))],
        out_specs=pl.BlockSpec((TM, N), lambda i: (i, 0)),
        compiler_params=_cparams("parallel", vmem_mb=vmem_mb),
    )(x2d, w_bf16, b.reshape(1, N), res2d, gamma.reshape(1, N), beta.reshape(1, N))


# ----------------------------------------------------------------------------
# fused FFN + residual + LayerNorm: out = LN(relu(x@w1+b1)@w2 + b2 + x)
# ----------------------------------------------------------------------------
def _ffn_ln_kernel(x_ref, w1_ref, b1_ref, w2_ref, b2_ref, g_ref, be_ref, o_ref, *, eps):
    x = x_ref[...]
    h = jnp.dot(x.astype(jnp.bfloat16), w1_ref[...],
                preferred_element_type=jnp.float32) + b1_ref[...]
    h = jnp.maximum(h, 0.0)                       # activation = relu
    y = jnp.dot(h.astype(jnp.bfloat16), w2_ref[...],
                preferred_element_type=jnp.float32) + b2_ref[...] + x
    mu = jnp.mean(y, axis=-1, keepdims=True)
    var = jnp.mean((y - mu) ** 2, axis=-1, keepdims=True)
    o_ref[...] = ((y - mu) * jax.lax.rsqrt(var + eps) * g_ref[...]
                  + be_ref[...]).astype(o_ref.dtype)


def ffn_ln(x2d, w1, b1, w2, b2, gamma, beta, *, eps=1e-5, tm=512, vmem_mb=48):
    M, D = x2d.shape
    F = w1.shape[1]
    TM = _row_tile(M, tm)
    return pl.pallas_call(
        functools.partial(_ffn_ln_kernel, eps=eps),
        out_shape=jax.ShapeDtypeStruct((M, D), x2d.dtype),
        grid=(pl.cdiv(M, TM),),
        in_specs=[pl.BlockSpec((TM, D), lambda i: (i, 0)),
                  pl.BlockSpec((D, F), lambda i: (0, 0)),
                  pl.BlockSpec((1, F), lambda i: (0, 0)),
                  pl.BlockSpec((F, D), lambda i: (0, 0)),
                  pl.BlockSpec((1, D), lambda i: (0, 0)),
                  pl.BlockSpec((1, D), lambda i: (0, 0)),
                  pl.BlockSpec((1, D), lambda i: (0, 0))],
        out_specs=pl.BlockSpec((TM, D), lambda i: (i, 0)),
        compiler_params=_cparams("parallel", vmem_mb=vmem_mb),
    )(x2d, w1, b1.reshape(1, F), w2, b2.reshape(1, D),
      gamma.reshape(1, D), beta.reshape(1, D))


# ----------------------------------------------------------------------------
# multi-head self-attention core. One grid step per batch element; each head's
# result is stored directly into its output channel slice (no concatenate).
# The 1/sqrt(hd) scale is folded into the Q projection weights.
# qk is the fused Q|K projection (Lq, 2D) in bf16, v is (Lq, D) in bf16.
# ----------------------------------------------------------------------------
def _mha_kernel(qk_ref, v_ref, o_ref, *, n_head, head_dim):
    # TODO(synk): attn_mask is not wired into the attention kernel (demo passes None).
    D = n_head * head_dim
    for h in range(n_head):
        q = qk_ref[0, :, h * head_dim:(h + 1) * head_dim]
        k = qk_ref[0, :, D + h * head_dim:D + (h + 1) * head_dim]
        v = v_ref[0, :, h * head_dim:(h + 1) * head_dim]
        s = jax.lax.dot_general(q, k, (((1,), (1,)), ((), ())),
                                preferred_element_type=jnp.float32)   # (Lq, Lq)
        s = s - jnp.max(s, axis=-1, keepdims=True)
        p = jnp.exp(s)
        p = p * pl.reciprocal(jnp.sum(p, axis=-1, keepdims=True), approx=True)
        o = jnp.dot(p.astype(jnp.bfloat16), v, preferred_element_type=jnp.float32)
        o_ref[0, :, h * head_dim:(h + 1) * head_dim] = o.astype(o_ref.dtype)


def mha_attention(qk, v, *, n_head, vmem_mb=32):
    # TODO(synk): on v7x (2 TCs) a second parallel grid axis (head / query tile)
    # would help when bs == 1; kept bs-only here since the MSDA dominates.
    bs, Lq, D2 = qk.shape
    D = D2 // 2
    hd = D // n_head
    return pl.pallas_call(
        functools.partial(_mha_kernel, n_head=n_head, head_dim=hd),
        out_shape=jax.ShapeDtypeStruct((bs, Lq, D), jnp.bfloat16),
        grid=(bs,),
        in_specs=[pl.BlockSpec((1, Lq, 2 * D), lambda b: (b, 0, 0)),
                  pl.BlockSpec((1, Lq, D), lambda b: (b, 0, 0))],
        out_specs=pl.BlockSpec((1, Lq, D), lambda b: (b, 0, 0)),
        compiler_params=_cparams("parallel", vmem_mb=vmem_mb),
    )(qk, v)


# ----------------------------------------------------------------------------
# multi-scale deformable attention core, gridded over (batch, head).
#   value_h : (bs, H, Len_v, hd) bf16  -> only one head's value resident/step
#   ref_xy  : (bs, Lq, 2L) f32         -> [ref_x (L) | ref_y (L)]
#   aux_h   : (bs, H, Lq, 3*L*P) f32   -> per head [off_x | off_y | logits]
# For each level: build the per-level bilinear one-hot sampling matrix
# A (Lq, H_l*W_l) (accumulated in `a_dtype`; use f32 on v5e which has no bf16
# VALU) from a single shared flat index per point (4 corners = d==0/1/W/W+1),
# then accumulate A @ value_level on the MXU in bf16.
# ----------------------------------------------------------------------------
def _msda_kernel(value_ref, ref_ref, aux_ref, o_ref, *,
                 head_dim, num_levels, num_points,
                 spatial_shapes, level_starts, a_dtype):
    L, P = num_levels, num_points
    LP = L * P
    Lq = ref_ref.shape[1]
    cdt = a_dtype
    zero = jnp.zeros((), cdt)

    off_x = aux_ref[0, 0, :, 0 * LP:1 * LP]                   # (Lq, L*P)
    off_y = aux_ref[0, 0, :, 1 * LP:2 * LP]
    logits = aux_ref[0, 0, :, 2 * LP:3 * LP]

    m = jnp.max(logits, axis=-1, keepdims=True)
    e = jnp.exp(logits - m)
    attn = e * pl.reciprocal(jnp.sum(e, axis=-1, keepdims=True), approx=True)

    acc = jnp.zeros((Lq, head_dim), jnp.float32)
    for l, (H, W) in enumerate(spatial_shapes):
        HW = H * W
        start = level_starts[l]
        # rematerialized per level (cheap) instead of keeping L planes live
        iota_hw = jax.lax.broadcasted_iota(jnp.int32, (Lq, HW), 1)

        rx = ref_ref[0, :, l:l + 1]                           # (Lq, 1)
        ry = ref_ref[0, :, L + l:L + l + 1]
        ox = off_x[:, l * P:(l + 1) * P]                      # (Lq, P)
        oy = off_y[:, l * P:(l + 1) * P]
        aw = attn[:, l * P:(l + 1) * P]

        # sampling_loc = ref + off / (W, H); pixel coord (align_corners=False):
        #   x_pix = loc_x * W - 0.5 = ref_x * W + off_x - 0.5
        x = rx * float(W) + ox - 0.5
        y = ry * float(H) + oy - 0.5
        x0 = jnp.floor(x)
        y0 = jnp.floor(y)
        fx = x - x0
        fy = y - y0
        x0i = x0.astype(jnp.int32)
        y0i = y0.astype(jnp.int32)
        base = y0i * W + x0i                                  # flat idx of (x0, y0)

        vx0 = (x0i >= 0) & (x0i < W)
        vx1 = (x0i >= -1) & (x0i < W - 1)
        vy0 = (y0i >= 0) & (y0i < H)
        vy1 = (y0i >= -1) & (y0i < H - 1)

        w00 = ((1.0 - fx) * (1.0 - fy) * aw * (vx0 & vy0).astype(jnp.float32)).astype(cdt)
        w01 = (fx * (1.0 - fy) * aw * (vx1 & vy0).astype(jnp.float32)).astype(cdt)
        w10 = ((1.0 - fx) * fy * aw * (vx0 & vy1).astype(jnp.float32)).astype(cdt)
        w11 = (fx * fy * aw * (vx1 & vy1).astype(jnp.float32)).astype(cdt)

        A = jnp.zeros((Lq, HW), cdt)
        for p in range(P):
            d = iota_hw - base[:, p:p + 1]                    # (Lq, HW)
            A = A + (jnp.where(d == 0, w00[:, p:p + 1], zero)
                     + jnp.where(d == 1, w01[:, p:p + 1], zero)
                     + jnp.where(d == W, w10[:, p:p + 1], zero)
                     + jnp.where(d == W + 1, w11[:, p:p + 1], zero))

        v_l = value_ref[0, 0, start:start + HW, :]            # (HW, hd) bf16
        acc = acc + jnp.dot(A.astype(jnp.bfloat16), v_l,
                            preferred_element_type=jnp.float32)
    o_ref[0, 0] = acc.astype(o_ref.dtype)


def msda_core(value_h, ref_xy, aux_h, spatial_shapes, *, n_points,
              a_dtype=jnp.bfloat16, vmem_mb=48):
    bs, n_head, Len_v, hd = value_h.shape
    Lq = ref_xy.shape[1]
    shapes, level_starts, s = [], [], 0
    for (H, W) in spatial_shapes:
        shapes.append((int(H), int(W)))
        level_starts.append(s)
        s += int(H) * int(W)
    L = len(shapes)
    kernel = functools.partial(
        _msda_kernel, head_dim=hd, num_levels=L, num_points=n_points,
        spatial_shapes=tuple(shapes), level_starts=tuple(level_starts),
        a_dtype=a_dtype)
    return pl.pallas_call(
        kernel,
        out_shape=jax.ShapeDtypeStruct((bs, n_head, Lq, hd), jnp.bfloat16),
        grid=(bs, n_head),
        in_specs=[pl.BlockSpec((1, 1, Len_v, hd), lambda b, h: (b, h, 0, 0)),
                  pl.BlockSpec((1, Lq, 2 * L), lambda b, h: (b, 0, 0)),
                  pl.BlockSpec((1, 1, Lq, 3 * L * n_points), lambda b, h: (b, h, 0, 0))],
        out_specs=pl.BlockSpec((1, 1, Lq, hd), lambda b, h: (b, h, 0, 0)),
        compiler_params=_cparams("parallel", "parallel", vmem_mb=vmem_mb),
    )(value_h, ref_xy, aux_h)


# ----------------------------------------------------------------------------
# full decoder layer forward
# ----------------------------------------------------------------------------
def transformer_decoder_layer(params, tgt, reference_points, memory,
                              memory_spatial_shapes, memory_level_start_index=None,
                              attn_mask=None, memory_mask=None,
                              query_pos_embed=None, *,
                              n_head, n_levels, n_points,
                              msda_a_dtype=jnp.bfloat16):
    del memory_level_start_index  # derived statically from spatial shapes
    bs, Lq, D = tgt.shape
    Len_v = memory.shape[1]
    hd = D // n_head
    L, P = n_levels, n_points
    LP = L * P

    tgt2d = tgt.reshape(-1, D)
    pos2d = (jnp.zeros_like(tgt2d) if query_pos_embed is None
             else query_pos_embed.reshape(-1, D))

    # ---------------- self attention ----------------
    # TODO(synk): attn_mask is not wired into the attention kernel (demo passes None).
    qk2d, v2d = sa_qkv_proj(tgt2d, pos2d, params["sa_wqk"], params["sa_bqk"],
                            params["sa_wv"], params["sa_bv"])
    attn_out = mha_attention(qk2d.reshape(bs, Lq, 2 * D),
                             v2d.reshape(bs, Lq, D), n_head=n_head)    # bf16
    tgt2d = linear_add_ln(attn_out.reshape(-1, D), params["sa_wo"], params["sa_bo"],
                          tgt2d, params["ln1_g"], params["ln1_b"])

    # ---------------- cross attention (MS deformable) ----------------
    value = linear(memory.reshape(-1, D), params["ca_wv"], params["ca_bv"],
                   out_dtype=jnp.bfloat16).reshape(bs, Len_v, n_head, hd)
    if memory_mask is not None:
        # reference semantics: value *= mask (True = non-padding / keep)
        value = value * memory_mask.astype(value.dtype)[:, :, None, None]
    value_h = jnp.transpose(value, (0, 2, 1, 3))              # (bs, H, Len_v, hd) bf16

    # fused (query+pos) @ [sampling_offsets | attention_weights]; weight columns
    # are stored pre-permuted so the output is already per-head contiguous
    # [off_x | off_y | logits] -> no de-interleave repack between pallas_calls.
    aux = linear_pos(tgt2d, pos2d, params["ca_w_offaw"], params["ca_b_offaw"])
    aux_h = jnp.transpose(aux.reshape(bs, Lq, n_head, 3 * LP), (0, 2, 1, 3))

    # reference_points: (bs, Lq, n_levels, 2), last dim = (x, y) in [0, 1]
    # TODO(synk): only the 2-coordinate reference_points branch is implemented (4-dim boxes not wired).
    ref_xy = jnp.concatenate([reference_points[..., 0],
                              reference_points[..., 1]], axis=-1)      # (bs, Lq, 2L)

    sampled_h = msda_core(value_h, ref_xy, aux_h, memory_spatial_shapes,
                          n_points=P, a_dtype=msda_a_dtype)            # (bs, H, Lq, hd)
    sampled = jnp.transpose(sampled_h, (0, 2, 1, 3)).reshape(-1, D)
    tgt2d = linear_add_ln(sampled, params["ca_wo"], params["ca_bo"],
                          tgt2d, params["ln2_g"], params["ln2_b"])

    # ---------------- FFN ----------------
    tgt2d = ffn_ln(tgt2d, params["ff_w1"], params["ff_b1"],
                   params["ff_w2"], params["ff_b2"],
                   params["ln3_g"], params["ln3_b"])
    return tgt2d.reshape(bs, Lq, D)


# ----------------------------------------------------------------------------
# deterministic parameter init (mirrors the module's __init__ shapes).
# Matmul weights are stored bf16 (MXU-native, pre-cast once). Q|K is fused with
# the 1/sqrt(hd) scale folded into the Q columns. The sampling-offset /
# attention-weight projection is fused AND column-permuted to the per-head
# [off_x | off_y | logits] layout consumed by msda_core.
# ----------------------------------------------------------------------------
def init_params(key, d_model, n_head, dim_ff, n_levels, n_points):
    ks = iter(jax.random.split(key, 3 * n_head + 8))
    bf16 = jnp.bfloat16

    def w(shape):
        return jax.random.normal(next(ks), shape, jnp.float32) * 0.05

    z = lambda n: jnp.zeros((n,), jnp.float32)
    o = lambda n: jnp.ones((n,), jnp.float32)
    hd = d_model // n_head
    LP = n_levels * n_points

    # sampling_offsets bias = the deterministic grid init from _reset_parameters
    thetas = jnp.arange(n_head, dtype=jnp.float32) * (2.0 * math.pi / n_head)
    grid_init = jnp.stack([jnp.cos(thetas), jnp.sin(thetas)], -1)
    grid_init = grid_init / jnp.max(jnp.abs(grid_init), axis=-1, keepdims=True)
    grid_init = jnp.tile(grid_init.reshape(n_head, 1, 1, 2), (1, n_levels, n_points, 1))
    scaling = jnp.arange(1, n_points + 1, dtype=jnp.float32).reshape(1, 1, -1, 1)
    grid_init = grid_init * scaling                            # (H, L, P, 2)

    w_blocks, b_blocks = [], []
    for h in range(n_head):
        w_blocks += [w((d_model, LP)), w((d_model, LP)), w((d_model, LP))]
        b_blocks += [grid_init[h, :, :, 0].reshape(-1),
                     grid_init[h, :, :, 1].reshape(-1),
                     jnp.zeros((LP,), jnp.float32)]
    ca_w_offaw = jnp.concatenate(w_blocks, axis=1).astype(bf16)
    ca_b_offaw = jnp.concatenate(b_blocks)

    scale = 1.0 / math.sqrt(hd)                                # folded into Q proj
    wq = w((d_model, d_model)) * scale
    wk = w((d_model, d_model))

    params = {
        # self-attention (nn.MultiheadAttention in-proj split; q & k fused)
        "sa_wqk": jnp.concatenate([wq, wk], axis=1).astype(bf16),
        "sa_bqk": z(2 * d_model),
        "sa_wv": w((d_model, d_model)).astype(bf16), "sa_bv": z(d_model),
        "sa_wo": w((d_model, d_model)).astype(bf16), "sa_bo": z(d_model),
        "ln1_g": o(d_model), "ln1_b": z(d_model),
        # MSDeformableAttention (sampling_offsets & attention_weights fused+permuted)
        "ca_wv": w((d_model, d_model)).astype(bf16), "ca_bv": z(d_model),
        "ca_w_offaw": ca_w_offaw, "ca_b_offaw": ca_b_offaw,
        "ca_wo": w((d_model, d_model)).astype(bf16), "ca_bo": z(d_model),
        "ln2_g": o(d_model), "ln2_b": z(d_model),
        # FFN
        "ff_w1": w((d_model, dim_ff)).astype(bf16), "ff_b1": z(dim_ff),
        "ff_w2": w((dim_ff, d_model)).astype(bf16), "ff_b2": z(d_model),
        "ln3_g": o(d_model), "ln3_b": z(d_model),
    }
    return params


if __name__ == "__main__":
    key = jax.random.PRNGKey(0)
    bs, Lq = 2, 8
    d_model, n_head = 32, 4
    dim_ff = 64
    n_levels, n_points = 3, 4
    spatial_shapes = [(8, 8), (4, 4), (4, 2)]
    level_start_index = [0, 64, 80]
    Len_v = sum(h * w for h, w in spatial_shapes)  # 88

    kp, k1, k2, k3, k4 = jax.random.split(key, 5)
    params = init_params(kp, d_model, n_head, dim_ff, n_levels, n_points)

    tgt = jax.random.normal(k1, (bs, Lq, d_model), jnp.float32)
    memory = jax.random.normal(k2, (bs, Len_v, d_model), jnp.float32)
    reference_points = jax.random.uniform(k3, (bs, Lq, n_levels, 2), jnp.float32)
    query_pos_embed = jax.random.normal(k4, (bs, Lq, d_model), jnp.float32) * 0.1

    out = transformer_decoder_layer(
        params, tgt, reference_points, memory, spatial_shapes,
        memory_level_start_index=level_start_index,
        attn_mask=None, memory_mask=None, query_pos_embed=query_pos_embed,
        n_head=n_head, n_levels=n_levels, n_points=n_points)
    out = jax.block_until_ready(out)

    assert out.shape == (bs, Lq, d_model)
    assert bool(jnp.all(jnp.isfinite(out)))
    print("KERNEL_OK")
</pallas_src>

<mosaic_0001>
module attributes {stable_mosaic.version = 11 : i64} {
  func.func @_sa_qkv_kernel(%arg0: i32, %arg1: memref<16x32xf32, #tpu.memory_space<vmem>>, %arg2: memref<16x32xf32, #tpu.memory_space<vmem>>, %arg3: memref<32x64xbf16, #tpu.memory_space<vmem>>, %arg4: memref<1x64xf32, #tpu.memory_space<vmem>>, %arg5: memref<32x32xbf16, #tpu.memory_space<vmem>>, %arg6: memref<1x32xf32, #tpu.memory_space<vmem>>, %arg7: memref<16x64xbf16, #tpu.memory_space<vmem>>, %arg8: memref<16x32xbf16, #tpu.memory_space<vmem>>) attributes {dimension_semantics = [#tpu.dimension_semantics<parallel>], iteration_bounds = array<i64: 1>, scalar_prefetch = 0 : i64, scratch_operands = 0 : i64, tpu.core_type = #tpu.core_type<tc>, window_params = [{transform_indices = @transform_0, window_bounds = array<i64: 16, 32>}, {transform_indices = @transform_1, window_bounds = array<i64: 16, 32>}, {pipeline_mode = #tpu.pipeline_mode<synchronous>, transform_indices = @transform_2, window_bounds = array<i64: 32, 64>}, {pipeline_mode = #tpu.pipeline_mode<synchronous>, transform_indices = @transform_3, window_bounds = array<i64: 1, 64>}, {pipeline_mode = #tpu.pipeline_mode<synchronous>, transform_indices = @transform_4, window_bounds = array<i64: 32, 32>}, {pipeline_mode = #tpu.pipeline_mode<synchronous>, transform_indices = @transform_5, window_bounds = array<i64: 1, 32>}, {transform_indices = @transform_6, window_bounds = array<i64: 16, 64>}, {transform_indices = @transform_7, window_bounds = array<i64: 16, 32>}]} {
    %c0 = arith.constant 0 : index
    %c0_0 = arith.constant 0 : index
    %0 = vector.load %arg1[%c0, %c0_0] : memref<16x32xf32, #tpu.memory_space<vmem>>, vector<16x32xf32>
    %c0_1 = arith.constant 0 : index
    %c0_2 = arith.constant 0 : index
    %1 = vector.load %arg2[%c0_1, %c0_2] : memref<16x32xf32, #tpu.memory_space<vmem>>, vector<16x32xf32>
    %2 = arith.addf %0, %1 : vector<16x32xf32>
    %3 = arith.truncf %2 : vector<16x32xf32> to vector<16x32xbf16>
    %c0_3 = arith.constant 0 : index
    %c0_4 = arith.constant 0 : index
    %4 = vector.load %arg3[%c0_3, %c0_4] : memref<32x64xbf16, #tpu.memory_space<vmem>>, vector<32x64xbf16>
    %cst = arith.constant dense<0.000000e+00> : vector<16x64xf32>
    %5 = tpu.matmul %3, %4, %cst {dimension_numbers = #tpu.dot_dimension_numbers<[1], [0], [0], [1], [0, 0, 1, 1], [], []>} : vector<16x32xbf16>, vector<32x64xbf16>, vector<16x64xf32> -> vector<16x64xf32>
    %c0_5 = arith.constant 0 : index
    %c0_6 = arith.constant 0 : index
    %6 = vector.load %arg4[%c0_5, %c0_6] : memref<1x64xf32, #tpu.memory_space<vmem>>, vector<1x64xf32>
    %7 = vector.broadcast %6 : vector<1x64xf32> to vector<16x64xf32>
    %8 = arith.addf %5, %7 : vector<16x64xf32>
    %9 = arith.truncf %8 : vector<16x64xf32> to vector<16x64xbf16>
    %c0_7 = arith.constant 0 : index
    %c0_8 = arith.constant 0 : index
    %10 = vector.load %arg7[%c0_7, %c0_8] : memref<16x64xbf16, #tpu.memory_space<vmem>>, vector<16x64xbf16>
    tpu.vector_store %arg7[%c0_7, %c0_8], %9 {strides = array<i32>} : memref<16x64xbf16, #tpu.memory_space<vmem>>, vector<16x64xbf16>,
    %11 = arith.truncf %0 : vector<16x32xf32> to vector<16x32xbf16>
    %c0_9 = arith.constant 0 : index
    %c0_10 = arith.constant 0 : index
    %12 = vector.load %arg5[%c0_9, %c0_10] : memref<32x32xbf16, #tpu.memory_space<vmem>>, vector<32x32xbf16>
    %cst_11 = arith.constant dense<0.000000e+00> : vector<16x32xf32>
    %13 = tpu.matmul %11, %12, %cst_11 {dimension_numbers = #tpu.dot_dimension_numbers<[1], [0], [0], [1], [0, 0, 1, 1], [], []>} : vector<16x32xbf16>, vector<32x32xbf16>, vector<16x32xf32> -> vector<16x32xf32>
    %c0_12 = arith.constant 0 : index
    %c0_13 = arith.constant 0 : index
    %14 = vector.load %arg6[%c0_12, %c0_13] : memref<1x32xf32, #tpu.memory_space<vmem>>, vector<1x32xf32>
    %15 = vector.broadcast %14 : vector<1x32xf32> to vector<16x32xf32>
    %16 = arith.addf %13, %15 : vector<16x32xf32>
    %17 = arith.truncf %16 : vector<16x32xf32> to vector<16x32xbf16>
    %c0_14 = arith.constant 0 : index
    %c0_15 = arith.constant 0 : index
    %18 = vector.load %arg8[%c0_14, %c0_15] : memref<16x32xbf16, #tpu.memory_space<vmem>>, vector<16x32xbf16>
    tpu.vector_store %arg8[%c0_14, %c0_15], %17 {strides = array<i32>} : memref<16x32xbf16, #tpu.memory_space<vmem>>, vector<16x32xbf16>,
    return
  }
  func.func @transform_0(%arg0: i32) -> (i32, i32) {
    %c0_i32 = arith.constant 0 : i32
    %c0_i32_0 = arith.constant 0 : i32
    return %arg0, %c0_i32 : i32, i32
  }
  func.func @transform_1(%arg0: i32) -> (i32, i32) {
    %c0_i32 = arith.constant 0 : i32
    %c0_i32_0 = arith.constant 0 : i32
    return %arg0, %c0_i32 : i32, i32
  }
  func.func @transform_2(%arg0: i32) -> (i32, i32) {
    %c0_i32 = arith.constant 0 : i32
    %c0_i32_0 = arith.constant 0 : i32
    %c0_i32_1 = arith.constant 0 : i32
    return %c0_i32, %c0_i32_0 : i32, i32
  }
  func.func @transform_3(%arg0: i32) -> (i32, i32) {
    %c0_i32 = arith.constant 0 : i32
    %c0_i32_0 = arith.constant 0 : i32
    %c0_i32_1 = arith.constant 0 : i32
    return %c0_i32, %c0_i32_0 : i32, i32
  }
  func.func @transform_4(%arg0: i32) -> (i32, i32) {
    %c0_i32 = arith.constant 0 : i32
    %c0_i32_0 = arith.constant 0 : i32
    %c0_i32_1 = arith.constant 0 : i32
    return %c0_i32, %c0_i32_0 : i32, i32
  }
  func.func @transform_5(%arg0: i32) -> (i32, i32) {
    %c0_i32 = arith.constant 0 : i32
    %c0_i32_0 = arith.constant 0 : i32
    %c0_i32_1 = arith.constant 0 : i32
    return %c0_i32, %c0_i32_0 : i32, i32
  }
  func.func @transform_6(%arg0: i32) -> (i32, i32) {
    %c0_i32 = arith.constant 0 : i32
    %c0_i32_0 = arith.constant 0 : i32
    return %arg0, %c0_i32 : i32, i32
  }
  func.func @transform_7(%arg0: i32) -> (i32, i32) {
    %c0_i32 = arith.constant 0 : i32
    %c0_i32_0 = arith.constant 0 : i32
    return %arg0, %c0_i32 : i32, i32
  }
}

</mosaic_0001>

<bundles_post_ra>
// kernel: tpu_custom_call.1
= control target key start
LH: loop header
LB: loop body
LE: loop exit
PB: predicated region body
PF: predicated region fallthrough
CT: control target
= control target key end

     0   :  { %13 = vsyncpa [#allocation3], 0  ;;  %s639_s0 = inlined_call_operand.hbm [shape: f32[16,32], index: 0, kind: input, shape index: {}]   ;;  %s640_s1 = inlined_call_operand.hbm [shape: f32[16,32], index: 1, kind: input, shape index: {}]   ;;  %s641_s2 = inlined_call_operand.hbm [shape: bf16[32,64], index: 2, kind: input, shape index: {}]   ;;  %s642_s3 = inlined_call_operand.vmem [shape: f32[1,64], index: 3, kind: input, shape index: {}]   ;;  %s643_s4 = inlined_call_operand.hbm [shape: bf16[32,32], index: 4, kind: input, shape index: {}]   ;;  %s644_s5 = inlined_call_operand.vmem [shape: f32[1,32], index: 5, kind: input, shape index: {}]   ;;  %s645_s6 = inlined_call_operand.hbm [shape: bf16[16,64], index: 6, kind: output, shape index: {0}]   ;;  %s646_s7 = inlined_call_operand.hbm [shape: bf16[16,32], index: 7, kind: output, shape index: {1}]  }
   0x1   :  { %14 = vsyncpa [#allocation6], 0 }
   0x2   :  { %15 = vsyncpa [#allocation9], 0 }
   0x3   :  { %16 = vsyncpa [#allocation4], 0 }
   0x4   :  { %17 = vsyncpa [#allocation12], 0  ;;  %s479_s24 = smov [#allocation5]   ;;  %s480_s26 = smov [#allocation2]  }
   0x5   :  { %s35_s25 = sshll.u32 %s479_s24, 4  ;;  %s23_s27 = sshll.u32 %s480_s26, 4  ;;  %s36_s25 = int_to_ptr.vmem [resolvable:$true] %s35_s25  ;;  %s531_s27 = int_to_ptr.vmem [resolvable:$true] %s23_s27 }
   0x6   :  { %s337_s30 = scalar_lea.hbm %s640_s1, 256 }
   0x7   :  { %p338_p0 = scmp.ne.s32.totalorder %s640_s1, %s337_s30  ;;  %p341_p1 = scmp.lt.u32.totalorder %s337_s30, %s640_s1 }
   0x9   :  { %p343_p2 = pnand %p341_p1, %p338_p0 }
   0xb   :  { %346 = shalt.err (!%p343_p2)
}
   0xc   :  { %s347_s12 = scalar_lea.vmem %s36_s25, 256  ;;  %p352_p4 = scmp.lt.s32.totalorder %s36_s25, %s36_s25 }
   0xd   :  { %p348_p3 = scmp.ne.s32.totalorder %s36_s25, %s347_s12  ;;  %p353_p5 = scmp.lt.s32.totalorder %s347_s12, %s347_s12 }
   0xf   :  { %p354_p6 = por %p353_p5, %p352_p4 }
  0x11   :  { %p355_p7 = pnand %p354_p6, %p348_p3 }
  0x13   :  { %358 = shalt.err (!%p355_p7)
}
  0x14   :  { %s481_s13 = smov 128   ;;  %s482_s14 = smov 8  }
  0x15   :  { %41 = dma.hbm_to_vmem [thread:$0]  %s640_s1, 256, %s36_s25, [#allocation6], %s481_s13, %s481_s13, %s482_s14  }
  0x16   :  { %s359_s19 = scalar_lea.hbm %s639_s0, 256 }
  0x17   :  { %p360_p8 = scmp.ne.s32.totalorder %s639_s0, %s359_s19  ;;  %p363_p9 = scmp.lt.u32.totalorder %s359_s19, %s639_s0 }
  0x19   :  { %p365_p10 = pnand %p363_p9, %p360_p8 }
  0x1b   :  { %368 = shalt.err (!%p365_p10)
}
  0x1c   :  { %s369_s24 = scalar_lea.vmem %s531_s27, 256  ;;  %p374_p12 = scmp.lt.s32.totalorder %s531_s27, %s531_s27 }
  0x1d   :  { %p370_p11 = scmp.ne.s32.totalorder %s531_s27, %s369_s24  ;;  %p375_p13 = scmp.lt.s32.totalorder %s369_s24, %s369_s24 }
  0x1f   :  { %p376_p0 = por %p375_p13, %p374_p12 }
  0x21   :  { %p377_p1 = pnand %p376_p0, %p370_p11 }
  0x23   :  { %380 = shalt.err (!%p377_p1)
}
  0x24   :  { %29 = dma.hbm_to_vmem [thread:$0]  %s639_s0, 256, %s531_s27, [#allocation3], %s481_s13, %s481_s13, %s482_s14  }
  0x25   :  { %s483_s26 = smov [#allocation7]   ;;  %s381_s8 = scalar_lea.hbm %s641_s2, 256 }
  0x26   :  { %s47_s28 = sshll.u32 %s483_s26, 4  ;;  %p382_p2 = scmp.ne.s32.totalorder %s641_s2, %s381_s8  ;;  %s48_s28 = int_to_ptr.vmem [resolvable:$true] %s47_s28 }
  0x27   :  { %p385_p3 = scmp.lt.u32.totalorder %s381_s8, %s641_s2 }
  0x29   :  { %p387_p4 = pnand %p385_p3, %p382_p2 }
  0x2b   :  { %390 = shalt.err (!%p387_p4)
}
  0x2c   :  { %s391_s15 = scalar_lea.vmem %s48_s28, 256  ;;  %p396_p6 = scmp.lt.s32.totalorder %s48_s28, %s48_s28 }
  0x2d   :  { %p392_p5 = scmp.ne.s32.totalorder %s48_s28, %s391_s15  ;;  %p397_p7 = scmp.lt.s32.totalorder %s391_s15, %s391_s15 }
  0x2f   :  { %p398_p8 = por %p397_p7, %p396_p6 }
  0x31   :  { %p399_p9 = pnand %p398_p8, %p392_p5 }
  0x33   :  { %402 = shalt.err (!%p399_p9)
}
  0x34   :  { %s484_s0 = smov 64   ;;  %s485_s27 = smov 4  }
  0x35   :  { %53 = dma.hbm_to_vmem [thread:$0]  %s641_s2, 256, %s48_s28, [#allocation6], %s484_s0, %s484_s0, %s485_s27  }
  0x36   :  { %s486_s16 = smov [#allocation8]   ;;  %s403_s20 = scalar_lea.hbm %s643_s4, 256 }
  0x37   :  { %s61_s17 = sshll.u32 %s486_s16, 4  ;;  %p404_p10 = scmp.ne.s32.totalorder %s643_s4, %s403_s20  ;;  %s62_s17 = int_to_ptr.vmem [resolvable:$true] %s61_s17 }
  0x38   :  { %p407_p11 = scmp.lt.u32.totalorder %s403_s20, %s643_s4 }
  0x3a   :  { %p409_p12 = pnand %p407_p11, %p404_p10 }
  0x3c   :  { %412 = shalt.err (!%p409_p12)
}
  0x3d   :  { %s413_s1 = scalar_lea.vmem %s62_s17, 256  ;;  %p418_p0 = scmp.lt.s32.totalorder %s62_s17, %s62_s17 }
  0x3e   :  { %p414_p13 = scmp.ne.s32.totalorder %s62_s17, %s413_s1  ;;  %p419_p1 = scmp.lt.s32.totalorder %s413_s1, %s413_s1 }
  0x40   :  { %p420_p2 = por %p419_p1, %p418_p0 }
  0x42   :  { %p421_p3 = pnand %p420_p2, %p414_p13 }
  0x44   :  { %424 = shalt.err (!%p421_p3)
}
  0x45   :  { %67 = dma.hbm_to_vmem [thread:$0]  %s643_s4, 256, %s62_s17, [#allocation9], %s484_s0, %s484_s0, %s485_s27  }
  0x46   :  { %469 = dma.done.wait [#allocation3], 256  }
  0x47   :  { %470 = vsyncadd [#allocation3], 4294967040 }
  0x48   :  { %471 = dma.done.wait [#allocation6], 512  }
  0x49   :  { %472 = vsyncadd [#allocation6], 4294966784 }
  0x4a   :  { %473 = dma.done.wait [#allocation9], 256  }
  0x4b   :  { %474 = vsyncadd [#allocation9], 4294967040  ;;  %v487_v0 = vmov 0.0   ;;  %vm488_vm0 = vmmov 0   ;;  %v333_v1 = vld [vmem:[#allocation7] sm:$0xff]   ;;  %v334_v2 = vld [vmem:[#allocation8] sm:$0xff]  }
  0x4c   :  { %305 = vmatprep.subr.bf16.mxu0 %v487_v0  ;;  %313 = vmatprep.subr.bf16.mxu1 %v487_v0  ;;  %v335_v3 = vld [vmem:[#allocation7 + $0x8] sm:$0xff]   ;;  %v336_v4 = vld [vmem:[#allocation8 + $0x8] sm:$0xff]   ;;  %v83_v5 = vld [vmem:[#allocation2] sm:$0xff]  ;;  %vm113_vm1 = vcmask 261120   ;;  %vm166_vm2 = vcmask 519168   ;;  %s489_s30 = smov [#allocation10]  }
  0x4d   :  { %309 = vmatprep.mubr.msk.bf16.mxu0 %vm488_vm0, %v487_v0  ;;  %317 = vmatprep.mubr.msk.bf16.mxu1 %vm488_vm0, %v487_v0  ;;  %v84_v6 = vld [vmem:[#allocation2 + $0x8] sm:$0xff]  ;;  %v85_v7 = vld [vmem:[#allocation5] sm:$0xff]  ;;  %v86_v8 = vld [vmem:[#allocation5 + $0x8] sm:$0xff]  ;;  %s253_s8 = sshll.u32 %s489_s30, 4  ;;  %vm245_vm3 = vcmask 257024   ;;  %s254_s8 = int_to_ptr.vmem [resolvable:$true] %s253_s8 }
  0x4e   :  { %306 = vmatpush3.bf16.msra.mxu0 %v333_v1  ;;  %314 = vmatpush3.bf16.msra.mxu1 %v334_v2  ;;  %v87_v9 = vadd.f32 %v85_v7, %v83_v5  ;;  %v88_v10 = vadd.f32 %v86_v8, %v84_v6  ;;  %v169_v11 = vpack.c.bf16 %v84_v6, %v83_v5  ;;  %v283_v13 = vld [vmem:[%s642_s3] ss:$0 sm:$0xff]  ;;  %s490_s3 = smov [#allocation11]   ;;  %s425_s9 = scalar_lea.vmem %s254_s8, 128 }
  0x4f   :  { %307 = vmatprep.subr.bf16.mxu0 %v487_v0  ;;  %315 = vmatprep.subr.bf16.mxu1 %v487_v0  ;;  %v289_v14 = vld [vmem:[%s644_s5] ss:$0 sm:$0xff]  ;;  %s265_s5 = sshll.u32 %s490_s3, 4  ;;  %p426_p4 = scmp.ne.s32.totalorder %s254_s8, %s425_s9  ;;  %s600_s5 = int_to_ptr.vmem [resolvable:$true] %s265_s5 }
  0x50   :  { %v89_v12 = vpack.c.bf16 %v88_v10, %v87_v9  ;;  %p430_p5 = scmp.lt.s32.totalorder %s254_s8, %s254_s8  ;;  %p431_p6 = scmp.lt.s32.totalorder %s425_s9, %s425_s9 }
  0x52   :  { %308 = vmatpush3.bf16.msra.mxu0 %v335_v3  ;;  %316 = vmatpush3.bf16.msra.mxu1 %v336_v4  ;;  %p432_p7 = por %p431_p6, %p430_p5 }
  0x54   :  { %p433_p8 = pnand %p432_p7, %p426_p4 }
  0x55   :  { %310 = vmatmul.mubr.msk.bf16.vlgmr.msra.gmra.mrb[0].mxu0 %vm113_vm1, %v89_v12  ;;  %318 = vmatmul.mubr.msk.bf16.vlgmr.msra.gmra.mrb[0].mxu1 %vm113_vm1, %v169_v11 }
 0x128   :  { %v151_v15 = vpop.f32.mrb[0].mxu0  ;;  %v230_v16 = vpop.f32.mrb[0].mxu1 }
 0x129   :  { %v152_v17 = vadd.f32 %v283_v13, %v151_v15  ;;  %v231_v18 = vadd.f32 %v289_v14, %v230_v16  ;;  %v311_v19 = vpop.f32.mrb[1].mxu0  ;;  %v319_v20 = vpop.f32.mrb[1].mxu1 }
 0x12a   :  { %v154_v21 = vpop.f32.mrb[2].mxu0  ;;  %v233_v22 = vpop.f32.mrb[2].mxu1 }
 0x12b   :  { %v295_v23 = vpack.c.bf16 %v152_v17, %v152_v17  ;;  %v297_v24 = vpack.c.bf16 %v231_v18, %v231_v18  ;;  %v155_v25 = vadd.f32 %v283_v13, %v154_v21  ;;  %v234_v26 = vadd.f32 %v289_v14, %v233_v22  ;;  %v312_v27 = vpop.f32.mrb[3].mxu0  ;;  %v320_v28 = vpop.f32.mrb[3].mxu1 }
 0x12d   :  { %v296_v29 = vpack.c.bf16 %v155_v25, %v155_v25  ;;  %v298_v30 = vpack.c.bf16 %v234_v26, %v234_v26  ;;  %167 = vst.msk [vmem:[#allocation10] sm:$0xf] %vm166_vm2, %v295_v23 }
 0x12e   :  { %246 = vst.msk [vmem:[#allocation11] sm:$0xf] %vm245_vm3, %v297_v24 }
 0x12f   :  { %168 = vst.msk [vmem:[#allocation10 + $0x4] sm:$0xf] %vm166_vm2, %v296_v29 }
 0x130   :  { %247 = vst.msk [vmem:[#allocation11 + $0x4] sm:$0xf] %vm245_vm3, %v298_v30 }
 0x131   :  { %436 = shalt.err (!%p433_p8)
}
 0x132   :  { %s437_s12 = scalar_lea.hbm %s645_s6, 128 }
 0x133   :  { %p438_p9 = scmp.ne.s32.totalorder %s645_s6, %s437_s12  ;;  %p441_p10 = scmp.lt.u32.totalorder %s437_s12, %s645_s6 }
 0x135   :  { %p443_p11 = pnand %p441_p10, %p438_p9 }
 0x137   :  { %446 = shalt.err (!%p443_p11)
}
 0x138   :  { %259 = dma.vmem_to_hbm [thread:$0]  %s254_s8, 128, %s645_s6, [#allocation4], %s484_s0, %s484_s0, %s485_s27  }
 0x139   :  { %s447_s19 = scalar_lea.vmem %s600_s5, 128  ;;  %p452_p13 = scmp.lt.s32.totalorder %s600_s5, %s600_s5 }
 0x13a   :  { %p448_p12 = scmp.ne.s32.totalorder %s600_s5, %s447_s19  ;;  %p453_p0 = scmp.lt.s32.totalorder %s447_s19, %s447_s19 }
 0x13c   :  { %p454_p1 = por %p453_p0, %p452_p13 }
 0x13e   :  { %p455_p2 = pnand %p454_p1, %p448_p12 }
 0x140   :  { %458 = shalt.err (!%p455_p2)
}
 0x141   :  { %s459_s22 = scalar_lea.hbm %s646_s7, 128 }
 0x142   :  { %p460_p3 = scmp.ne.s32.totalorder %s646_s7, %s459_s22  ;;  %p463_p4 = scmp.lt.u32.totalorder %s459_s22, %s646_s7 }
 0x144   :  { %p465_p5 = pnand %p463_p4, %p460_p3 }
 0x146   :  { %468 = shalt.err (!%p465_p5)
}
 0x147   :  { %271 = dma.vmem_to_hbm [thread:$0]  %s600_s5, 128, %s646_s7, [#allocation12], %s484_s0, %s484_s0, %s485_s27  }
 0x148   :  { %475 = dma.done.wait [#allocation4], 128  }
 0x149   :  { %476 = vsyncadd [#allocation4], 4294967168 }
 0x14a   :  { %477 = dma.done.wait [#allocation12], 128  }
 0x14b   :  { %478 = vsyncadd [#allocation12], 4294967168 }
 0x14c   :  { %278 = vsyncpa [#allocation3], 1 }
 0x14d   :  { %279 = vsyncpa [#allocation6], 1 }
 0x14e   :  { %280 = vsyncpa [#allocation9], 1 }
 0x14f   :  { %281 = vsyncpa [#allocation4], 1 }
 0x150   :  { %282 = vsyncpa [#allocation12], 1 }

</bundles_post_ra>
